<compile_context>
chip_gen: v7x
topology: tpu7x:2x2x1
jax: 0.10.0
libtpu: 0.0.40
codegen_flags: <defaults>
</compile_context>

<pallas_src>
import functools

import jax
import jax.numpy as jnp
import numpy as np
from jax import lax
from jax.experimental import pallas as pl
from jax.experimental.pallas import tpu as pltpu

NEG = -10000.0
NA_POS = 3


# --------------------------------------------------------------------------------------
# semantics helpers (mirror the PyTorch module; used by the pure-JAX reference check)
# --------------------------------------------------------------------------------------
def mask_pos0(x, mask):
    # TODO(synk): mask_pos0 source not provided with the module; assumed masked-fill(-10000)
    #             where mask == 0 (x * m + (1 - m) * NEG).
    return x * mask + (1.0 - mask) * NEG


def get_span_mask(seq_len, max_ans_len):
    """Non-Pallas replica of Answerer.get_span_mask (used only by the reference check)."""
    m = jnp.tril(jnp.triu(jnp.ones((seq_len, seq_len), jnp.float32), 0), max_ans_len - 1)
    m = m.at[:4, :].set(0.0)
    m = m.at[1, 1].set(1.0)
    m = m.at[2, 2].set(1.0)
    m = m.at[NA_POS, NA_POS].set(1.0)
    return m


# --------------------------------------------------------------------------------------
# fused Answerer kernel (one batch element per grid step)
# --------------------------------------------------------------------------------------
def _answerer_kernel(seq_ref, am_ref, w_ref, b_ref,
                     st_ref, en_ref, ts_ref, te_ref, *, max_ans_len):
    S = seq_ref.shape[1]

    # ---- qa_outputs projection: bf16 operands on the MXU, f32 accumulation ----
    x = seq_ref[0].astype(jnp.bfloat16)                                   # (S, H)
    lg = jnp.dot(x, w_ref[...], preferred_element_type=jnp.float32)       # (S, 2)
    lg = lg + b_ref[...]

    # ---- mask_pos0 with the answer mask (applies to both start/end columns) ----
    am = am_ref[0]                                                        # (S, 1)
    lg = lg * am + (1.0 - am) * NEG

    st = lg[:, 0:1]                                                       # (S, 1) start logits
    en = lg[:, 1:2]                                                       # (S, 1) end logits
    st_ref[0] = st
    en_ref[0] = en

    # ---- windowed span scoring: O(S * max_ans_len) instead of the (S, S) score matrix ----
    # span_mask semantics folded in:  valid(start=s, offset=d):
    #   (s >= 4 and s + d <= S - 1)   or   (1 <= s <= NA_POS and d == 0);   row 0 never valid.
    # Invalid entries take the value NEG exactly, matching mask_pos0 on the full matrix.
    pos = lax.broadcasted_iota(jnp.int32, (S, 1), 0)                      # start index on sublanes
    en_pad = jnp.concatenate(
        [en, jnp.full((max_ans_len, 1), NEG, jnp.float32)], axis=0)       # (S + L, 1)

    best_val = None
    best_d = None
    for d in range(max_ans_len):                                          # small static unroll
        en_d = lax.slice_in_dim(en_pad, d, d + S, axis=0)                 # en_d[s] = en[s + d]
        valid = (pos >= 4) & (pos <= (S - 1 - d))
        if d == 0:
            valid = valid | ((pos >= 1) & (pos <= NA_POS))
        score = jnp.where(valid, st + en_d, NEG)                          # (S, 1)
        if d == 0:
            best_val = score
            best_d = jnp.zeros((S, 1), jnp.int32)
        else:
            upd = score > best_val                                        # strict > keeps smallest d
            best_val = jnp.where(upd, score, best_val)
            best_d = jnp.where(upd, d, best_d)

    # ---- global top-1 over start positions (first occurrence on ties, row-major parity) ----
    col_max = jnp.max(best_val, axis=0, keepdims=True)                    # (1, 1)
    is_max = best_val == col_max
    top_s = jnp.min(jnp.where(is_max, pos, S), axis=0, keepdims=True)     # (1, 1) int32
    sel = pos == top_s
    top_d = jnp.sum(jnp.where(sel, best_d, 0), axis=0, keepdims=True)     # (1, 1) int32

    ts_ref[0] = top_s
    te_ref[0] = top_s + top_d


def answerer_forward(qa_weight, qa_bias, seq_hiddens, ans_mask, *, max_ans_len, top_k=1):
    """Answerer.forward.  qa_weight is (H, 2) = nn.Linear(H, 2).weight.T (pre-transposed)."""
    if top_k != 1:
        # TODO(synk): torch argsort top-k path for top_k > 1 not implemented (default top_k=1 only).
        raise NotImplementedError("only top_k == 1 (argmax) is implemented")
    B, S, H = seq_hiddens.shape

    w = qa_weight.astype(jnp.bfloat16)                                    # (H, 2) bf16 for the MXU
    b = qa_bias.reshape(1, 2).astype(jnp.float32)
    am = ans_mask.reshape(B, S, 1).astype(jnp.float32)

    kernel = functools.partial(_answerer_kernel, max_ans_len=max_ans_len)
    out_shape = (
        jax.ShapeDtypeStruct((B, S, 1), jnp.float32),                     # start_logits
        jax.ShapeDtypeStruct((B, S, 1), jnp.float32),                     # end_logits
        jax.ShapeDtypeStruct((B, 1, 1), jnp.int32),                       # top_start
        jax.ShapeDtypeStruct((B, 1, 1), jnp.int32),                       # top_end
    )
    cost = pl.CostEstimate(
        flops=2 * B * S * H * 2 + B * S * max_ans_len * 4,
        transcendentals=0,
        bytes_accessed=seq_hiddens.size * 4 + am.size * 4 + w.size * 2 + 2 * B * S * 4 + 2 * B * 4,
    )

    start3, end3, ts3, te3 = pl.pallas_call(
        kernel,
        grid=(B,),
        in_specs=[
            pl.BlockSpec((1, S, H), lambda bi: (bi, 0, 0)),               # seq_hiddens: one batch row/step
            pl.BlockSpec((1, S, 1), lambda bi: (bi, 0, 0)),               # ans_mask
            pl.BlockSpec((H, 2), lambda bi: (0, 0)),                      # qa weight (resident, bf16)
            pl.BlockSpec((1, 2), lambda bi: (0, 0)),                      # qa bias
        ],
        out_specs=(
            pl.BlockSpec((1, S, 1), lambda bi: (bi, 0, 0)),
            pl.BlockSpec((1, S, 1), lambda bi: (bi, 0, 0)),
            pl.BlockSpec((1, 1, 1), lambda bi: (bi, 0, 0)),
            pl.BlockSpec((1, 1, 1), lambda bi: (bi, 0, 0)),
        ),
        out_shape=out_shape,
        compiler_params=pltpu.CompilerParams(dimension_semantics=("parallel",)),
        cost_estimate=cost,
    )(seq_hiddens, am, w, b)

    # TODO(synk): for very long sequences (S*H block > scoped VMEM) an extra S-tiled grid axis
    #             with a carried running-best would be needed; not required at these shapes.
    return start3[..., 0], end3[..., 0], ts3[:, 0, 0], te3[:, 0, 0]


# --------------------------------------------------------------------------------------
# pure-JAX reference (full (S,S) masked score matrix, exactly as the PyTorch module)
# --------------------------------------------------------------------------------------
def answerer_reference(qa_weight, qa_bias, seq_hiddens, ans_mask, *, max_ans_len):
    B, S, _ = seq_hiddens.shape
    lg = jnp.einsum("bsh,ho->bso",
                    seq_hiddens.astype(jnp.bfloat16), qa_weight.astype(jnp.bfloat16),
                    preferred_element_type=jnp.float32) + qa_bias.reshape(1, 1, 2)
    lg = mask_pos0(lg, ans_mask[..., None])
    st, en = lg[..., 0], lg[..., 1]
    scores = st[:, :, None] + en[:, None, :]
    scores = mask_pos0(scores, get_span_mask(S, max_ans_len)[None])
    top = jnp.argmax(scores.reshape(B, S * S), axis=-1)
    return st, en, top // S, top % S


# --------------------------------------------------------------------------------------
if __name__ == "__main__":
    B, S, H = 2, 16, 32
    MAX_ANS_LEN = 5

    keys = jax.random.split(jax.random.PRNGKey(0), 3)
    seq_hiddens = jax.random.normal(keys[0], (B, S, H), jnp.float32)
    ans_mask = jnp.ones((B, S), jnp.float32).at[:, S - 2:].set(0.0)
    qa_weight = 0.05 * jax.random.normal(keys[1], (H, 2), jnp.float32)    # nn.Linear(H, 2).weight.T
    qa_bias = 0.05 * jax.random.normal(keys[2], (2,), jnp.float32)

    fwd = jax.jit(functools.partial(answerer_forward, max_ans_len=MAX_ANS_LEN))
    start_logits, end_logits, top_start, top_end = fwd(qa_weight, qa_bias, seq_hiddens, ans_mask)
    jax.block_until_ready((start_logits, end_logits, top_start, top_end))

    # correctness check against the plain-XLA reference of the same (bf16 matmul) computation
    r_st, r_en, r_ts, r_te = answerer_reference(
        qa_weight, qa_bias, seq_hiddens, ans_mask, max_ans_len=MAX_ANS_LEN)
    np.testing.assert_allclose(np.asarray(start_logits), np.asarray(r_st), atol=5e-2, rtol=1e-3)
    np.testing.assert_allclose(np.asarray(end_logits), np.asarray(r_en), atol=5e-2, rtol=1e-3)
    assert np.array_equal(np.asarray(top_start), np.asarray(r_ts))
    assert np.array_equal(np.asarray(top_end), np.asarray(r_te))

    print("KERNEL_OK")
</pallas_src>

<mosaic_0001>
module attributes {stable_mosaic.version = 11 : i64} {
  func.func @_answerer_kernel(%arg0: i32, %arg1: memref<1x16x32xf32, #tpu.memory_space<vmem>>, %arg2: memref<1x16x1xf32, #tpu.memory_space<vmem>>, %arg3: memref<32x2xbf16, #tpu.memory_space<vmem>>, %arg4: memref<1x2xf32, #tpu.memory_space<vmem>>, %arg5: memref<1x16x1xf32, #tpu.memory_space<vmem>>, %arg6: memref<1x16x1xf32, #tpu.memory_space<vmem>>, %arg7: memref<1x1x1xi32, #tpu.memory_space<vmem>>, %arg8: memref<1x1x1xi32, #tpu.memory_space<vmem>>) attributes {dimension_semantics = [#tpu.dimension_semantics<parallel>], iteration_bounds = array<i64: 2>, scalar_prefetch = 0 : i64, scratch_operands = 0 : i64, tpu.core_type = #tpu.core_type<tc>, window_params = [{transform_indices = @transform_0, window_bounds = array<i64: 1, 16, 32>}, {transform_indices = @transform_1, window_bounds = array<i64: 1, 16, 1>}, {pipeline_mode = #tpu.pipeline_mode<synchronous>, transform_indices = @transform_2, window_bounds = array<i64: 32, 2>}, {pipeline_mode = #tpu.pipeline_mode<synchronous>, transform_indices = @transform_3, window_bounds = array<i64: 1, 2>}, {transform_indices = @transform_4, window_bounds = array<i64: 1, 16, 1>}, {transform_indices = @transform_5, window_bounds = array<i64: 1, 16, 1>}, {transform_indices = @transform_6, window_bounds = array<i64: 1, 1, 1>}, {transform_indices = @transform_7, window_bounds = array<i64: 1, 1, 1>}]} {
    %c0 = arith.constant 0 : index
    %c0_0 = arith.constant 0 : index
    %c0_1 = arith.constant 0 : index
    %0 = vector.load %arg1[%c0, %c0_0, %c0_1] : memref<1x16x32xf32, #tpu.memory_space<vmem>>, vector<1x16x32xf32>
    %1 = vector.shape_cast %0 : vector<1x16x32xf32> to vector<16x32xf32>
    %2 = arith.truncf %1 : vector<16x32xf32> to vector<16x32xbf16>
    %c0_2 = arith.constant 0 : index
    %c0_3 = arith.constant 0 : index
    %3 = vector.load %arg3[%c0_2, %c0_3] : memref<32x2xbf16, #tpu.memory_space<vmem>>, vector<32x2xbf16>
    %cst = arith.constant dense<0.000000e+00> : vector<16x2xf32>
    %4 = tpu.matmul %2, %3, %cst {dimension_numbers = #tpu.dot_dimension_numbers<[1], [0], [0], [1], [0, 0, 1, 1], [], []>} : vector<16x32xbf16>, vector<32x2xbf16>, vector<16x2xf32> -> vector<16x2xf32>
    %c0_4 = arith.constant 0 : index
    %c0_5 = arith.constant 0 : index
    %5 = vector.load %arg4[%c0_4, %c0_5] : memref<1x2xf32, #tpu.memory_space<vmem>>, vector<1x2xf32>
    %6 = vector.broadcast %5 : vector<1x2xf32> to vector<16x2xf32>
    %7 = arith.addf %4, %6 : vector<16x2xf32>
    %c0_6 = arith.constant 0 : index
    %c0_7 = arith.constant 0 : index
    %c0_8 = arith.constant 0 : index
    %8 = vector.load %arg2[%c0_6, %c0_7, %c0_8] : memref<1x16x1xf32, #tpu.memory_space<vmem>>, vector<1x16x1xf32>
    %9 = vector.shape_cast %8 : vector<1x16x1xf32> to vector<16x1xf32>
    %10 = vector.broadcast %9 : vector<16x1xf32> to vector<16x2xf32>
    %11 = arith.mulf %7, %10 : vector<16x2xf32>
    %cst_9 = arith.constant 1.000000e+00 : f32
    %12 = vector.broadcast %cst_9 : f32 to vector<16x1xf32>
    %13 = arith.subf %12, %9 : vector<16x1xf32>
    %cst_10 = arith.constant -1.000000e+04 : f32
    %14 = vector.broadcast %cst_10 : f32 to vector<16x1xf32>
    %15 = arith.mulf %13, %14 : vector<16x1xf32>
    %16 = vector.broadcast %15 : vector<16x1xf32> to vector<16x2xf32>
    %17 = arith.addf %11, %16 : vector<16x2xf32>
    %18 = vector.extract_strided_slice %17 {offsets = [0, 0], sizes = [16, 1], strides = [1, 1]} : vector<16x2xf32> to vector<16x1xf32>
    %19 = vector.extract_strided_slice %17 {offsets = [0, 1], sizes = [16, 1], strides = [1, 1]} : vector<16x2xf32> to vector<16x1xf32>
    %c0_11 = arith.constant 0 : index
    %c0_12 = arith.constant 0 : index
    %c0_13 = arith.constant 0 : index
    %20 = vector.load %arg5[%c0_11, %c0_12, %c0_13] : memref<1x16x1xf32, #tpu.memory_space<vmem>>, vector<1x16x1xf32>
    %21 = vector.shape_cast %20 : vector<1x16x1xf32> to vector<16x1xf32>
    %22 = vector.shape_cast %18 : vector<16x1xf32> to vector<1x16x1xf32>
    tpu.vector_store %arg5[%c0_11, %c0_12, %c0_13], %22 {strides = array<i32>} : memref<1x16x1xf32, #tpu.memory_space<vmem>>, vector<1x16x1xf32>,
    %c0_14 = arith.constant 0 : index
    %c0_15 = arith.constant 0 : index
    %c0_16 = arith.constant 0 : index
    %23 = vector.load %arg6[%c0_14, %c0_15, %c0_16] : memref<1x16x1xf32, #tpu.memory_space<vmem>>, vector<1x16x1xf32>
    %24 = vector.shape_cast %23 : vector<1x16x1xf32> to vector<16x1xf32>
    %25 = vector.shape_cast %19 : vector<16x1xf32> to vector<1x16x1xf32>
    tpu.vector_store %arg6[%c0_14, %c0_15, %c0_16], %25 {strides = array<i32>} : memref<1x16x1xf32, #tpu.memory_space<vmem>>, vector<1x16x1xf32>,
    %26 = tpu.iota {dimensions = array<i32: 0>} : vector<16x1xi32>
    %cst_17 = arith.constant -1.000000e+04 : f32
    %27 = vector.broadcast %cst_17 : f32 to vector<5x1xf32>
    %28 = tpu.concatenate %19, %27 in 0 : vector<16x1xf32>, vector<5x1xf32> -> vector<21x1xf32>
    %29 = vector.extract_strided_slice %28 {offsets = [0, 0], sizes = [16, 1], strides = [1, 1]} : vector<21x1xf32> to vector<16x1xf32>
    %c4_i32 = arith.constant 4 : i32
    %30 = vector.broadcast %c4_i32 : i32 to vector<16x1xi32>
    %31 = arith.cmpi sge, %26, %30 : vector<16x1xi32>
    %c15_i32 = arith.constant 15 : i32
    %32 = vector.broadcast %c15_i32 : i32 to vector<16x1xi32>
    %33 = arith.cmpi sle, %26, %32 : vector<16x1xi32>
    %34 = arith.andi %31, %33 : vector<16x1xi1>
    %c1_i32 = arith.constant 1 : i32
    %35 = vector.broadcast %c1_i32 : i32 to vector<16x1xi32>
    %36 = arith.cmpi sge, %26, %35 : vector<16x1xi32>
    %c3_i32 = arith.constant 3 : i32
    %37 = vector.broadcast %c3_i32 : i32 to vector<16x1xi32>
    %38 = arith.cmpi sle, %26, %37 : vector<16x1xi32>
    %39 = arith.andi %36, %38 : vector<16x1xi1>
    %40 = arith.ori %34, %39 : vector<16x1xi1>
    %41 = arith.addf %18, %29 : vector<16x1xf32>
    %cst_18 = arith.constant -1.000000e+04 : f32
    %42 = vector.broadcast %cst_18 : f32 to vector<16x1xf32>
    %43 = arith.select %40, %41, %42 : vector<16x1xi1>, vector<16x1xf32>
    %c0_i32 = arith.constant 0 : i32
    %44 = vector.broadcast %c0_i32 : i32 to vector<16x1xi32>
    %45 = vector.extract_strided_slice %28 {offsets = [1, 0], sizes = [16, 1], strides = [1, 1]} : vector<21x1xf32> to vector<16x1xf32>
    %c4_i32_19 = arith.constant 4 : i32
    %46 = vector.broadcast %c4_i32_19 : i32 to vector<16x1xi32>
    %47 = arith.cmpi sge, %26, %46 : vector<16x1xi32>
    %c14_i32 = arith.constant 14 : i32
    %48 = vector.broadcast %c14_i32 : i32 to vector<16x1xi32>
    %49 = arith.cmpi sle, %26, %48 : vector<16x1xi32>
    %50 = arith.andi %47, %49 : vector<16x1xi1>
    %51 = arith.addf %18, %45 : vector<16x1xf32>
    %cst_20 = arith.constant -1.000000e+04 : f32
    %52 = vector.broadcast %cst_20 : f32 to vector<16x1xf32>
    %53 = arith.select %50, %51, %52 : vector<16x1xi1>, vector<16x1xf32>
    %54 = arith.cmpf ogt, %53, %43 : vector<16x1xf32>
    %55 = arith.select %54, %53, %43 : vector<16x1xi1>, vector<16x1xf32>
    %c1_i32_21 = arith.constant 1 : i32
    %56 = vector.broadcast %c1_i32_21 : i32 to vector<16x1xi32>
    %57 = arith.select %54, %56, %44 : vector<16x1xi1>, vector<16x1xi32>
    %58 = vector.extract_strided_slice %28 {offsets = [2, 0], sizes = [16, 1], strides = [1, 1]} : vector<21x1xf32> to vector<16x1xf32>
    %c4_i32_22 = arith.constant 4 : i32
    %59 = vector.broadcast %c4_i32_22 : i32 to vector<16x1xi32>
    %60 = arith.cmpi sge, %26, %59 : vector<16x1xi32>
    %c13_i32 = arith.constant 13 : i32
    %61 = vector.broadcast %c13_i32 : i32 to vector<16x1xi32>
    %62 = arith.cmpi sle, %26, %61 : vector<16x1xi32>
    %63 = arith.andi %60, %62 : vector<16x1xi1>
    %64 = arith.addf %18, %58 : vector<16x1xf32>
    %cst_23 = arith.constant -1.000000e+04 : f32
    %65 = vector.broadcast %cst_23 : f32 to vector<16x1xf32>
    %66 = arith.select %63, %64, %65 : vector<16x1xi1>, vector<16x1xf32>
    %67 = arith.cmpf ogt, %66, %55 : vector<16x1xf32>
    %68 = arith.select %67, %66, %55 : vector<16x1xi1>, vector<16x1xf32>
    %c2_i32 = arith.constant 2 : i32
    %69 = vector.broadcast %c2_i32 : i32 to vector<16x1xi32>
    %70 = arith.select %67, %69, %57 : vector<16x1xi1>, vector<16x1xi32>
    %71 = vector.extract_strided_slice %28 {offsets = [3, 0], sizes = [16, 1], strides = [1, 1]} : vector<21x1xf32> to vector<16x1xf32>
    %c4_i32_24 = arith.constant 4 : i32
    %72 = vector.broadcast %c4_i32_24 : i32 to vector<16x1xi32>
    %73 = arith.cmpi sge, %26, %72 : vector<16x1xi32>
    %c12_i32 = arith.constant 12 : i32
    %74 = vector.broadcast %c12_i32 : i32 to vector<16x1xi32>
    %75 = arith.cmpi sle, %26, %74 : vector<16x1xi32>
    %76 = arith.andi %73, %75 : vector<16x1xi1>
    %77 = arith.addf %18, %71 : vector<16x1xf32>
    %cst_25 = arith.constant -1.000000e+04 : f32
    %78 = vector.broadcast %cst_25 : f32 to vector<16x1xf32>
    %79 = arith.select %76, %77, %78 : vector<16x1xi1>, vector<16x1xf32>
    %80 = arith.cmpf ogt, %79, %68 : vector<16x1xf32>
    %81 = arith.select %80, %79, %68 : vector<16x1xi1>, vector<16x1xf32>
    %c3_i32_26 = arith.constant 3 : i32
    %82 = vector.broadcast %c3_i32_26 : i32 to vector<16x1xi32>
    %83 = arith.select %80, %82, %70 : vector<16x1xi1>, vector<16x1xi32>
    %84 = vector.extract_strided_slice %28 {offsets = [4, 0], sizes = [16, 1], strides = [1, 1]} : vector<21x1xf32> to vector<16x1xf32>
    %c4_i32_27 = arith.constant 4 : i32
    %85 = vector.broadcast %c4_i32_27 : i32 to vector<16x1xi32>
    %86 = arith.cmpi sge, %26, %85 : vector<16x1xi32>
    %c11_i32 = arith.constant 11 : i32
    %87 = vector.broadcast %c11_i32 : i32 to vector<16x1xi32>
    %88 = arith.cmpi sle, %26, %87 : vector<16x1xi32>
    %89 = arith.andi %86, %88 : vector<16x1xi1>
    %90 = arith.addf %18, %84 : vector<16x1xf32>
    %cst_28 = arith.constant -1.000000e+04 : f32
    %91 = vector.broadcast %cst_28 : f32 to vector<16x1xf32>
    %92 = arith.select %89, %90, %91 : vector<16x1xi1>, vector<16x1xf32>
    %93 = arith.cmpf ogt, %92, %81 : vector<16x1xf32>
    %94 = arith.select %93, %92, %81 : vector<16x1xi1>, vector<16x1xf32>
    %c4_i32_29 = arith.constant 4 : i32
    %95 = vector.broadcast %c4_i32_29 : i32 to vector<16x1xi32>
    %96 = arith.select %93, %95, %83 : vector<16x1xi1>, vector<16x1xi32>
    %cst_30 = arith.constant dense<0xFF800000> : vector<1xf32>
    %97 = vector.multi_reduction <maximumf>, %94, %cst_30 [0] : vector<16x1xf32> to vector<1xf32>
    %98 = vector.shape_cast %97 : vector<1xf32> to vector<1x1xf32>
    %99 = vector.broadcast %98 : vector<1x1xf32> to vector<16x1xf32>
    %100 = arith.cmpf oeq, %94, %99 : vector<16x1xf32>
    %c16_i32 = arith.constant 16 : i32
    %101 = vector.broadcast %c16_i32 : i32 to vector<16x1xi32>
    %102 = arith.select %100, %26, %101 : vector<16x1xi1>, vector<16x1xi32>
    %cst_31 = arith.constant dense<2147483647> : vector<1xi32>
    %103 = vector.multi_reduction <minsi>, %102, %cst_31 [0] : vector<16x1xi32> to vector<1xi32>
    %104 = vector.shape_cast %103 : vector<1xi32> to vector<1x1xi32>
    %105 = vector.broadcast %104 : vector<1x1xi32> to vector<16x1xi32>
    %106 = arith.cmpi eq, %26, %105 : vector<16x1xi32>
    %c0_i32_32 = arith.constant 0 : i32
    %107 = vector.broadcast %c0_i32_32 : i32 to vector<16x1xi32>
    %108 = arith.select %106, %96, %107 : vector<16x1xi1>, vector<16x1xi32>
    %cst_33 = arith.constant dense<0> : vector<1xi32>
    %109 = vector.multi_reduction <add>, %108, %cst_33 [0] : vector<16x1xi32> to vector<1xi32>
    %110 = vector.shape_cast %109 : vector<1xi32> to vector<1x1xi32>
    %c0_34 = arith.constant 0 : index
    %c0_35 = arith.constant 0 : index
    %c0_36 = arith.constant 0 : index
    %111 = vector.load %arg7[%c0_34, %c0_35, %c0_36] : memref<1x1x1xi32, #tpu.memory_space<vmem>>, vector<1x1x1xi32>
    %112 = vector.shape_cast %111 : vector<1x1x1xi32> to vector<1x1xi32>
    %113 = vector.shape_cast %104 : vector<1x1xi32> to vector<1x1x1xi32>
    tpu.vector_store %arg7[%c0_34, %c0_35, %c0_36], %113 {strides = array<i32>} : memref<1x1x1xi32, #tpu.memory_space<vmem>>, vector<1x1x1xi32>,
    %114 = arith.addi %104, %110 : vector<1x1xi32>
    %c0_37 = arith.constant 0 : index
    %c0_38 = arith.constant 0 : index
    %c0_39 = arith.constant 0 : index
    %115 = vector.load %arg8[%c0_37, %c0_38, %c0_39] : memref<1x1x1xi32, #tpu.memory_space<vmem>>, vector<1x1x1xi32>
    %116 = vector.shape_cast %115 : vector<1x1x1xi32> to vector<1x1xi32>
    %117 = vector.shape_cast %114 : vector<1x1xi32> to vector<1x1x1xi32>
    tpu.vector_store %arg8[%c0_37, %c0_38, %c0_39], %117 {strides = array<i32>} : memref<1x1x1xi32, #tpu.memory_space<vmem>>, vector<1x1x1xi32>,
    return
  }
  func.func @transform_0(%arg0: i32) -> (i32, i32, i32) {
    %c0_i32 = arith.constant 0 : i32
    %c0_i32_0 = arith.constant 0 : i32
    %c0_i32_1 = arith.constant 0 : i32
    return %arg0, %c0_i32, %c0_i32_0 : i32, i32, i32
  }
  func.func @transform_1(%arg0: i32) -> (i32, i32, i32) {
    %c0_i32 = arith.constant 0 : i32
    %c0_i32_0 = arith.constant 0 : i32
    %c0_i32_1 = arith.constant 0 : i32
    return %arg0, %c0_i32, %c0_i32_0 : i32, i32, i32
  }
  func.func @transform_2(%arg0: i32) -> (i32, i32) {
    %c0_i32 = arith.constant 0 : i32
    %c0_i32_0 = arith.constant 0 : i32
    %c0_i32_1 = arith.constant 0 : i32
    return %c0_i32, %c0_i32_0 : i32, i32
  }
  func.func @transform_3(%arg0: i32) -> (i32, i32) {
    %c0_i32 = arith.constant 0 : i32
    %c0_i32_0 = arith.constant 0 : i32
    %c0_i32_1 = arith.constant 0 : i32
    return %c0_i32, %c0_i32_0 : i32, i32
  }
  func.func @transform_4(%arg0: i32) -> (i32, i32, i32) {
    %c0_i32 = arith.constant 0 : i32
    %c0_i32_0 = arith.constant 0 : i32
    %c0_i32_1 = arith.constant 0 : i32
    return %arg0, %c0_i32, %c0_i32_0 : i32, i32, i32
  }
  func.func @transform_5(%arg0: i32) -> (i32, i32, i32) {
    %c0_i32 = arith.constant 0 : i32
    %c0_i32_0 = arith.constant 0 : i32
    %c0_i32_1 = arith.constant 0 : i32
    return %arg0, %c0_i32, %c0_i32_0 : i32, i32, i32
  }
  func.func @transform_6(%arg0: i32) -> (i32, i32, i32) {
    %c0_i32 = arith.constant 0 : i32
    %c0_i32_0 = arith.constant 0 : i32
    %c0_i32_1 = arith.constant 0 : i32
    return %arg0, %c0_i32, %c0_i32_0 : i32, i32, i32
  }
  func.func @transform_7(%arg0: i32) -> (i32, i32, i32) {
    %c0_i32 = arith.constant 0 : i32
    %c0_i32_0 = arith.constant 0 : i32
    %c0_i32_1 = arith.constant 0 : i32
    return %arg0, %c0_i32, %c0_i32_0 : i32, i32, i32
  }
}

</mosaic_0001>

<bundles_post_ra>
// kernel: answerer_forward.1
= control target key start
LH: loop header
LB: loop body
LE: loop exit
PB: predicated region body
PF: predicated region fallthrough
CT: control target
= control target key end

     0   :  { %s866_s24 = smov 0   ;;  %s1033_s0 = inlined_call_operand.vmem [shape: f32[2,16,32], index: 0, kind: input, shape index: {}]   ;;  %s1034_s1 = inlined_call_operand.vmem [shape: f32[2,16,1], index: 1, kind: input, shape index: {}]   ;;  %s1035_s2 = inlined_call_operand.vmem [shape: bf16[32,2], index: 2, kind: input, shape index: {}]   ;;  %s1036_s3 = inlined_call_operand.vmem [shape: f32[1,2], index: 3, kind: input, shape index: {}]   ;;  %s1037_s4 = inlined_call_operand.vmem [shape: f32[2,16,1], index: 4, kind: output, shape index: {0}]   ;;  %s1038_s5 = inlined_call_operand.vmem [shape: f32[2,16,1], index: 5, kind: output, shape index: {1}]   ;;  %s1039_s6 = inlined_call_operand.vmem [shape: s32[2,1,1], index: 6, kind: output, shape index: {2}]   ;;  %s1040_s7 = inlined_call_operand.vmem [shape: s32[2,1,1], index: 7, kind: output, shape index: {3}]  }
   0x1 LB: > { %s762_s25 = sadd.s32 4294967295, %s819_s24   ;;  %p766_p0 = scmp.ge.s32.totalorder %s819_s24, 1  ;;  %s819_s24 = sphi %s866_s24, %s18_s24  }
   0x2   : > { %p254_p1 = scmp.lt.s32.totalorder %s819_s24, 3 }
   0x4   : > { %p255_p2 = pnand %p766_p0, %p254_p1 }
   0x5   : > { %v811_v0 = vld [vmem:[%s1035_s2] sm:$0xff] (!%p255_p2)   ;;  %v821_v1 = vmov (!%p255_p2), 0.0   ;;  %v812_v2 = vld [vmem:[%s1035_s2 + $0x8] sm:$0xff] (!%p255_p2)   ;;  %vm822_vm0 = vmmov (!%p255_p2), 0   ;;  %p302_p3 = scmp.lt.s32.totalorder (!%p255_p2), %s762_s25, 1  ;;  %v823_v3 = vmov (!%p255_p2), 0   ;;  %v443_v49 = vlaneseq (!%p255_p2) }
   0x6   : > { %258 = sbr.rel (%p255_p2) target bundleno = 427 (0x1ab), region = 36  ;;  %788 = vmatprep.subr.bf16.mxu0 (!%p255_p2), %v821_v1  ;;  %792 = vmatprep.mubr.msk.bf16.mxu0 (!%p255_p2), %vm822_vm0, %v821_v1  ;;  %vm355_vm1 = vcmask (!%p255_p2), 261120   ;;  %v775_v14 = vld [vmem:[%s1036_s3] ss:$0 sm:$0xff] (!%p255_p2)  ;;  %vm430_vm2 = vcmask (!%p255_p2), 7168   ;;  %s824_s19 = smov (!%p255_p2), 127  }
   0x7   : > { %789 = vmatpush3.bf16.msra.mxu0 (!%p255_p2), %v811_v0  ;;  %809 = vset.pattern.permute.xlu0 (!%p255_p2), %v823_v3  ;;  %v825_v28 = vmov (!%p255_p2), -10000.0   ;;  %vm469_vm3 = vcmask (!%p255_p2), 1046528   ;;  %vm495_vm4 = vcmask (!%p255_p2), 1045504   ;;  %vm521_vm5 = vcmask (!%p255_p2), 1044480  }
   0x8   : > { %790 = vmatprep.subr.bf16.mxu0 (!%p255_p2), %v821_v1  ;;  %810 = vset.pattern.permute.xlu1 (!%p255_p2), %v823_v3  ;;  %v473_v29 = vrot.slane (!%p255_p2), %v825_v28, 1  ;;  %v499_v35 = vrot.slane (!%p255_p2), %v825_v28, 2  ;;  %v525_v40 = vrot.slane (!%p255_p2), %v825_v28, 3  ;;  %vm547_vm6 = vcmask (!%p255_p2), 1043456  }
   0x9   : > { %v551_v45 = vrot.slane (!%p255_p2), %v825_v28, 4  ;;  %v930_v50 = vshrl.u32 (!%p255_p2), %v443_v49, 7 }
   0xb   : > { %791 = vmatpush3.bf16.msra.mxu0 (!%p255_p2), %v812_v2  ;;  %vm452_vm7 = vcmp.ge.s32.totalorder (!%p255_p2), %v930_v50, 1  ;;  %vm454_vm8 = vcmp.le.s32.totalorder (!%p255_p2), %v930_v50, 3  ;;  %v940_v52 = vadd.s32 (!%p255_p2), 8, %v930_v50  ;;  %vm446_vm9 = vcmp.ge.s32.totalorder (!%p255_p2), %v930_v50, 4 }
   0xc   : > { %vm456_vm10 = vmand (!%p255_p2), %vm452_vm7, %vm454_vm8 }
   0xd   : > { %s1042_s25 = smov (!%p302_p3, %s762_s25), 1  ;;  %vm465_vm11 = vcmp.le.s32.totalorder %v940_v52, 14  ;;  %vm458_vm12 = vmor %vm446_vm9, %vm456_vm10  ;;  %vm492_vm15 = vcmp.le.s32.totalorder %v940_v52, 13 }
   0xe   : > { %s885_s30 = sshll.u32 %s1042_s25, 4  ;;  %s324_s27 = scalar_lea.vmem %s1039_s6, %s1042_s25 }
   0xf   : > { %s306_s10 = scalar_lea.vmem %s1033_s0, %s885_s30  ;;  %s311_s13 = scalar_lea.vmem %s1034_s1, %s885_s30 }
  0x10   : > { %v329_v4 = vld [vmem:[%s306_s10] sm:$0xff]  ;;  %v330_v5 = vld [vmem:[%s306_s10 + $0x8] sm:$0xff]  ;;  %s316_s18 = scalar_lea.vmem %s1037_s4, %s885_s30  ;;  %s321_s22 = scalar_lea.vmem %s1038_s5, %s885_s30 }
  0x11   : > { %v331_v6 = vpack.c.bf16 %v330_v5, %v329_v4  ;;  %v400_v7 = vld [vmem:[%s311_s13] sm:$0xff]  ;;  %v401_v8 = vld [vmem:[%s311_s13 + $0x8] sm:$0xff]  ;;  %s327_s30 = scalar_lea.vmem %s1040_s7, %s1042_s25 }
  0x12   : > { %404 = vperm.xlu0 %809, %v400_v7   ;;  %v414_v9 = vsub.f32 1.0, %v400_v7  ;;  %v415_v10 = vsub.f32 1.0, %v401_v8 }
  0x13   : > { %793 = vmatmul.mubr.msk.bf16.vlgmr.msra.gmra.mrb[0].mxu0 %vm355_vm1, %v331_v6 }
  0x14   : > { %v416_v11 = vmul.f32 -10000.0, %v414_v9  ;;  %v417_v12 = vmul.f32 -10000.0, %v415_v10 }
  0x16   : > { %420 = vperm.xlu1 %810, %v416_v11   ;;  %409 = vperm.xlu0 %809, %v401_v8  }
  0x1a   : > { %425 = vperm.xlu1 %810, %v417_v12  }
  0x91   : > { %v405_v13 = vpop.permute.xlu0 %404 }
  0x95   : > { %v421_v15 = vpop.permute.xlu1 %420  ;;  %v410_v23 = vpop.permute.xlu0 %409 }
  0x99   : > { %v426_v26 = vpop.permute.xlu1 %425 }
  0xe6   : > { %v393_v16 = vpop.f32.mrb[0].mxu0 }
  0xe7   : > { %v394_v17 = vadd.f32 %v775_v14, %v393_v16  ;;  %v794_v18 = vpop.f32.mrb[1].mxu0 }
  0xe8   : > { %v396_v19 = vpop.f32.mrb[2].mxu0 }
  0xe9   : > { %v412_v20 = vmul.f32 %v405_v13, %v394_v17  ;;  %v397_v21 = vadd.f32 %v775_v14, %v396_v19  ;;  %v795_v22 = vpop.f32.mrb[3].mxu0 }
  0xeb   : > { %v902_v24 = vadd.f32 %v421_v15, %v412_v20  ;;  %v413_v25 = vmul.f32 %v410_v23, %v397_v21 }
  0xed   : > { %v904_v27 = vadd.f32 %v426_v26, %v413_v25  ;;  %435 = vrot.lane.b32.xlu0 %v902_v24, %s824_s19  ;;  %431 = vst.msk [vmem:[%s316_s18] sm:$0xff] %vm430_vm2, %v902_v24  ;;  %v470_v31 = vrot.slane %v902_v24, 1  ;;  %v496_v36 = vrot.slane %v902_v24, 2  ;;  %v522_v41 = vrot.slane %v902_v24, 3 }
  0xee   : > { %v548_v46 = vrot.slane %v902_v24, 4 }
  0xef   : > { %437 = vrot.lane.b32.xlu1 %v904_v27, %s824_s19  ;;  %v471_v30 = vrot.slane %v904_v27, 1  ;;  %432 = vst.msk [vmem:[%s316_s18 + $0x8] sm:$0xff] %vm430_vm2, %v904_v27  ;;  %v497_v34 = vrot.slane %v904_v27, 2  ;;  %v523_v38 = vrot.slane %v904_v27, 3  ;;  %v549_v43 = vrot.slane %v904_v27, 4 }
  0xf1   : > { %v474_v32 = vsel %vm469_vm3, %v471_v30, %v473_v29  ;;  %v472_v33 = vsel %vm469_vm3, %v470_v31, %v471_v30  ;;  %v498_v37 = vsel %vm495_vm4, %v496_v36, %v497_v34  ;;  %v500_v39 = vsel %vm495_vm4, %v497_v34, %v499_v35 }
  0xf2   : > { %477 = vrot.lane.b32.xlu0 %v474_v32, %s824_s19  ;;  %v524_v42 = vsel %vm521_vm5, %v522_v41, %v523_v38  ;;  %v526_v44 = vsel %vm521_vm5, %v523_v38, %v525_v40  ;;  %v550_v47 = vsel %vm547_vm6, %v548_v46, %v549_v43  ;;  %v552_v48 = vsel %vm547_vm6, %v549_v43, %v551_v45 }
  0xf3   : > { %475 = vrot.lane.b32.xlu1 %v472_v33, %s824_s19  ;;  %vm518_vm3 = vcmp.le.s32.totalorder %v940_v52, 12  ;;  %vm544_vm6 = vcmp.le.s32.totalorder %v940_v52, 11 }
  0xf6   : > { %501 = vrot.lane.b32.xlu0 %v498_v37, %s824_s19 }
  0xf7   : > { %503 = vrot.lane.b32.xlu1 %v500_v39, %s824_s19 }
  0xfa   : > { %527 = vrot.lane.b32.xlu0 %v524_v42, %s824_s19 }
  0xfb   : > { %529 = vrot.lane.b32.xlu1 %v526_v44, %s824_s19 }
  0xfe   : > { %553 = vrot.lane.b32.xlu0 %v550_v47, %s824_s19 }
  0xff   : > { %555 = vrot.lane.b32.xlu1 %v552_v48, %s824_s19 }
 0x15f   : > { %v436_v51 = vpop.permute.xlu0 %435 }
 0x160   : > { %441 = vst.msk [vmem:[%s321_s22] sm:$0xff] %vm430_vm2, %v436_v51  ;;  %v460_v54 = vadd.f32 %v436_v51, %v902_v24 }
 0x161   : > { %v438_v53 = vpop.permute.xlu1 %437 }
 0x162   : > { %442 = vst.msk [vmem:[%s321_s22 + $0x8] sm:$0xff] %vm430_vm2, %v438_v53  ;;  %v951_v59 = vadd.f32 %v438_v53, %v904_v27  ;;  %v955_v61 = vsel %vm458_vm12, %v460_v54, -10000.0 }
 0x164   : > { %v478_v55 = vpop.permute.xlu0 %477 }
 0x165   : > { %v482_v56 = vadd.f32 %v478_v55, %v904_v27  ;;  %v476_v57 = vpop.permute.xlu1 %475 }
 0x166   : > { %v481_v58 = vadd.f32 %v476_v57, %v902_v24 }
 0x167   : > { %v953_v60 = vsel %vm465_vm11, %v482_v56, -10000.0 }
 0x168   : > { %v959_v62 = vsel %vm446_vm9, %v481_v58, -10000.0  ;;  %v502_v63 = vpop.permute.xlu0 %501  ;;  %vm486_vm13 = vcmp.gt.f32.partialorder %v953_v60, %v951_v59 }
 0x169   : > { %vm485_vm14 = vcmp.gt.f32.partialorder %v959_v62, %v955_v61  ;;  %v507_v0 = vadd.f32 %v502_v63, %v902_v24  ;;  %v504_v1 = vpop.permute.xlu1 %503  ;;  %v488_v6 = vsel %vm486_vm13, %v953_v60, %v951_v59  ;;  %v490_v45 = vsel %vm486_vm13, 1, %v823_v3 }
 0x16a   : > { %v487_v2 = vsel %vm485_vm14, %v959_v62, %v955_v61  ;;  %v508_v4 = vadd.f32 %v504_v1, %v904_v27  ;;  %v489_v46 = vsel %vm485_vm14, 1, %v823_v3 }
 0x16b   : > { %v509_v5 = vsel %vm446_vm9, %v507_v0, -10000.0 }
 0x16c   : > { %vm511_vm0 = vcmp.gt.f32.partialorder %v509_v5, %v487_v2  ;;  %v510_v7 = vsel %vm492_vm15, %v508_v4, -10000.0  ;;  %v528_v8 = vpop.permute.xlu0 %527 }
 0x16d   : > { %vm512_vm1 = vcmp.gt.f32.partialorder %v510_v7, %v488_v6  ;;  %v533_v9 = vadd.f32 %v528_v8, %v902_v24  ;;  %v530_v10 = vpop.permute.xlu1 %529  ;;  %v513_v12 = vsel %vm511_vm0, %v509_v5, %v487_v2  ;;  %v515_v47 = vsel %vm511_vm0, 2, %v489_v46 }
 0x16e   : > { %v534_v11 = vadd.f32 %v530_v10, %v904_v27  ;;  %v514_v14 = vsel %vm512_vm1, %v510_v7, %v488_v6  ;;  %v516_v48 = vsel %vm512_vm1, 2, %v490_v45 }
 0x16f   : > { %v535_v13 = vsel %vm446_vm9, %v533_v9, -10000.0 }
 0x170   : > { %vm537_vm4 = vcmp.gt.f32.partialorder %v535_v13, %v513_v12  ;;  %v536_v15 = vsel %vm518_vm3, %v534_v11, -10000.0  ;;  %v554_v16 = vpop.permute.xlu0 %553  ;;  %vm608_vm3 = vcmask 0  }
 0x171   : > { %vm538_vm5 = vcmp.gt.f32.partialorder %v536_v15, %v514_v14  ;;  %v559_v17 = vadd.f32 %v554_v16, %v902_v24  ;;  %v556_v18 = vpop.permute.xlu1 %555  ;;  %v539_v20 = vsel %vm537_vm4, %v535_v13, %v513_v12  ;;  %v541_v49 = vsel %vm537_vm4, 3, %v515_v47 }
 0x172   : > { %v560_v19 = vadd.f32 %v556_v18, %v904_v27  ;;  %v540_v22 = vsel %vm538_vm5, %v536_v15, %v514_v14  ;;  %v542_v51 = vsel %vm538_vm5, 3, %v516_v48 }
 0x173   : > { %v561_v21 = vsel %vm446_vm9, %v559_v17, -10000.0 }
 0x174   : > { %vm563_vm7 = vcmp.gt.f32.partialorder %v561_v21, %v539_v20  ;;  %v562_v23 = vsel %vm544_vm6, %v560_v19, -10000.0 }
 0x175   : > { %v565_v25 = vsel %vm563_vm7, %v561_v21, %v539_v20  ;;  %vm564_vm8 = vcmp.gt.f32.partialorder %v562_v23, %v540_v22  ;;  %v567_v54 = vsel %vm563_vm7, 4, %v541_v49 }
 0x176   : > { %v569_v26 = vsel %vm430_vm2, %v565_v25, -inf  ;;  %v566_v24 = vsel %vm564_vm8, %v562_v23, %v540_v22  ;;  %v568_v3 = vsel %vm564_vm8, 4, %v542_v51 }
 0x177   : > { %v570_v28 = vsel %vm430_vm2, %v566_v24, -inf }
 0x178   : > { %v571_v29 = vmax.f32 %v569_v26, %v570_v28 }
 0x17a   : > { %v572_v27 = vrot.slane %v571_v29, 4 }
 0x17c   : > { %v573_v30 = vmax.f32 %v571_v29, %v572_v27 }
 0x17e   : > { %v574_v31 = vrot.slane %v573_v30, 2 }
 0x180   : > { %v575_v32 = vmax.f32 %v573_v30, %v574_v31 }
 0x182   : > { %v576_v33 = vrot.slane %v575_v32, 1 }
 0x184   : > { %v577_v34 = vmax.f32 %v575_v32, %v576_v33 }
 0x186   : > { %vm578_vm9 = vcmp.eq.f32.partialorder %v565_v25, %v577_v34  ;;  %vm579_vm10 = vcmp.eq.f32.partialorder %v566_v24, %v577_v34 }
 0x187   : > { %v580_v35 = vsel %vm578_vm9, %v930_v50, 16  ;;  %v581_v36 = vsel %vm579_vm10, %v940_v52, 16 }
 0x188   : > { %v582_v37 = vsel %vm430_vm2, %v580_v35, 2147483647  ;;  %v583_v38 = vsel %vm430_vm2, %v581_v36, 2147483647 }
 0x189   : > { %vm584_vm11 = vcmp.lt.s32.totalorder %v582_v37, %v583_v38 }
 0x18a   : > { %v585_v39 = vsel %vm584_vm11, %v582_v37, %v583_v38 }
 0x18b   : > { %v586_v40 = vrot.slane %v585_v39, 4 }
 0x18d   : > { %vm587_vm12 = vcmp.lt.s32.totalorder %v585_v39, %v586_v40 }
 0x18e   : > { %v588_v41 = vsel %vm587_vm12, %v585_v39, %v586_v40 }
 0x18f   : > { %v589_v42 = vrot.slane %v588_v41, 2 }
 0x191   : > { %vm590_vm15 = vcmp.lt.s32.totalorder %v588_v41, %v589_v42 }
 0x192   : > { %v591_v43 = vsel %vm590_vm15, %v588_v41, %v589_v42 }
 0x193   : > { %v592_v44 = vrot.slane %v591_v43, 1 }
 0x195   : > { %vm593_vm6 = vcmp.lt.s32.totalorder %v591_v43, %v592_v44 }
 0x196   : > { %v594_v53 = vsel %vm593_vm6, %v591_v43, %v592_v44 }
 0x197   : > { %vm595_vm13 = vcmp.eq.s32.totalorder %v930_v50, %v594_v53  ;;  %vm596_vm14 = vcmp.eq.s32.totalorder %v940_v52, %v594_v53  ;;  %609 = vst.msk [vmem:[%s324_s27] sm:$0x1] %vm608_vm3, %v594_v53 }
 0x198   : > { %v597_v55 = vsel %vm595_vm13, %v567_v54, 0  ;;  %v598_v56 = vsel %vm596_vm14, %v568_v3, 0 }
 0x199   : > { %v599_v57 = vsel %vm430_vm2, %v597_v55, 0  ;;  %v600_v58 = vsel %vm430_vm2, %v598_v56, 0 }
 0x19a   : > { %v601_v59 = vadd.s32 %v600_v58, %v599_v57 }
 0x19c   : > { %v602_v60 = vrot.slane %v601_v59, 4 }
 0x19e   : > { %v603_v61 = vadd.s32 %v602_v60, %v601_v59 }
 0x1a0   : > { %v604_v62 = vrot.slane %v603_v61, 2 }
 0x1a2   : > { %v605_v63 = vadd.s32 %v604_v62, %v603_v61 }
 0x1a4   : > { %v606_v0 = vrot.slane %v605_v63, 1 }
 0x1a6   : > { %v607_v1 = vadd.s32 %v606_v0, %v605_v63 }
 0x1a8   : > { %v610_v50 = vadd.s32 %v607_v1, %v594_v53 }
 0x1aa   : > { %611 = vst.msk [vmem:[%s327_s30] sm:$0x1] %vm608_vm3, %v610_v50 }
 0x1ab PF: > { %s18_s24 = sadd.s32 1, %s819_s24  }
 0x1ac   : > { %p15_p4 = scmp.ge.s32.totalorder %s18_s24, 4  }
 0x1ae   :  { %17 = sbr.rel (!%p15_p4) target bundleno = 1 (0x1), region = 105 }

</bundles_post_ra>
